<compile_context>
chip_gen: v7x
topology: tpu7x:2x2x1
jax: 0.10.0
libtpu: 0.0.40
codegen_flags: <defaults>
</compile_context>

<pallas_src>
import jax
import jax.numpy as jnp
from jax import lax
from jax.experimental import pallas as pl
from jax.experimental.pallas import tpu as pltpu


def _round_up(x, m):
    return ((x + m - 1) // m) * m


# ---------------------------------------------------------------------------
# Pallas kernel bodies
# ---------------------------------------------------------------------------

def _rbf_kernel_single(gamma_ref, x_sq_ref, l_sq_ref, x_ref, l_ref, o_ref):
    """One (tn, tm) output tile, full contraction dim in one shot."""
    # Contract last dims directly (no l.T -> no XLU transpose); operands keep
    # their native dtype, accumulation is f32 on the MXU.
    xl = lax.dot_general(
        x_ref[...], l_ref[...],
        (((1,), (1,)), ((), ())),
        preferred_element_type=jnp.float32)
    d2 = jnp.maximum(x_sq_ref[...] + l_sq_ref[...] - 2.0 * xl, 0.0)
    o_ref[...] = jnp.exp(-gamma_ref[0, 0] * d2).astype(o_ref.dtype)


def _rbf_kernel_ktiled(gamma_ref, x_sq_ref, l_sq_ref, x_ref, l_ref, o_ref,
                       acc_ref):
    """One (tn, tm) output tile accumulated over a tiled contraction axis."""
    k = pl.program_id(2)

    @pl.when(k == 0)
    def _():
        acc_ref[...] = jnp.zeros_like(acc_ref)

    acc_ref[...] += lax.dot_general(
        x_ref[...], l_ref[...],
        (((1,), (1,)), ((), ())),
        preferred_element_type=jnp.float32)

    @pl.when(k == pl.num_programs(2) - 1)
    def _():
        d2 = jnp.maximum(x_sq_ref[...] + l_sq_ref[...] - 2.0 * acc_ref[...], 0.0)
        o_ref[...] = jnp.exp(-gamma_ref[0, 0] * d2).astype(o_ref.dtype)


# ---------------------------------------------------------------------------
# Metric wrappers (plain-JAX glue + pallas_call)
# ---------------------------------------------------------------------------

def rbf_metric(X, landmark, *, gamma=1.0, tn=None, tm=None, tk=None):
    """Pallas RBF kernel matrix: K = exp(-gamma * ||X_i - L_j||^2), shape (N, M)."""
    N, D = X.shape
    M, D2 = landmark.shape
    assert D == D2, "feature dims must match"

    in_dtype = jnp.result_type(X.dtype, landmark.dtype)
    X = X.astype(in_dtype)
    L = landmark.astype(in_dtype)
    itemsize = jnp.dtype(in_dtype).itemsize

    # Row norms computed once in the wrapper (tiny XLA reductions in f32), so the
    # kernel never recomputes them nor transposes a (tm, 1) vector per tile.
    x_sq = jnp.sum(X.astype(jnp.float32) ** 2, axis=-1, keepdims=True)        # (N, 1)
    l_sq = jnp.sum(L.astype(jnp.float32) ** 2, axis=-1, keepdims=True).T      # (1, M)

    # ---- tile selection (re-derived per call) -------------------------------
    # Output tile stays lane-dense (tm multiple of 128); tn multiple of 8.
    if tn is None:
        tn = min(512, _round_up(N, 8))
    if tm is None:
        tm = min(512, _round_up(M, 128))
    if tk is None:
        # Only tile the contraction dim when the feature dim is large; for the
        # common "few landmarks, modest D" case L stays resident across the grid.
        tk = D if D <= 2048 else 512

    # Conservative VMEM budget so double-buffered tiles also fit v7x (64 MiB).
    budget = 40 * 1024 * 1024

    def _vmem_bytes(tn_, tm_, tk_):
        return (2 * (tn_ + tm_) * tk_ * itemsize   # X / L tiles, double-buffered
                + 2 * (tn_ + tm_) * 4              # norm tiles
                + 2 * tn_ * tm_ * 4                # output tiles
                + tn_ * tm_ * 4)                   # f32 accumulator scratch

    while _vmem_bytes(tn, tm, tk) > budget:
        if tk == D and D > 512:
            tk = 512                               # switch on K tiling
        elif tk != D and tk > 128:
            tk = max(128, tk // 2)
        elif tn > 128:
            tn = max(128, _round_up(tn // 2, 8))
        elif tm > 128:
            tm = max(128, _round_up(tm // 2, 128))
        else:
            break

    Np = _round_up(N, tn)
    Mp = _round_up(M, tm)
    Dp = D if tk == D else _round_up(D, tk)
    grid = (Np // tn, Mp // tm, Dp // tk)

    # Zero-pad to tile multiples (zero features don't change norms/dot products;
    # padded rows/cols are sliced off the output).
    if Np != N or Dp != D:
        X = jnp.pad(X, ((0, Np - N), (0, Dp - D)))
    if Mp != M or Dp != D:
        L = jnp.pad(L, ((0, Mp - M), (0, Dp - D)))
    if Np != N:
        x_sq = jnp.pad(x_sq, ((0, Np - N), (0, 0)))
    if Mp != M:
        l_sq = jnp.pad(l_sq, ((0, 0), (0, Mp - M)))

    # gamma as an SMEM scalar -> no recompile per gamma value.
    gamma_arr = jnp.full((1, 1), gamma, dtype=jnp.float32)

    single_k = grid[2] == 1
    body = _rbf_kernel_single if single_k else _rbf_kernel_ktiled
    scratch = [] if single_k else [pltpu.VMEM((tn, tm), jnp.float32)]

    in_specs = [
        pl.BlockSpec((1, 1), lambda i, j, k: (0, 0),
                     memory_space=pltpu.MemorySpace.SMEM),        # gamma
        pl.BlockSpec((tn, 1), lambda i, j, k: (i, 0)),            # ||x||^2
        pl.BlockSpec((1, tm), lambda i, j, k: (0, j)),            # ||l||^2
        pl.BlockSpec((tn, tk), lambda i, j, k: (i, k)),           # X tile
        pl.BlockSpec((tm, tk), lambda i, j, k: (j, k)),           # landmark tile
    ]
    out_specs = pl.BlockSpec((tn, tm), lambda i, j, k: (i, j))

    cost = pl.CostEstimate(
        flops=int(2.0 * Np * Mp * Dp + 4.0 * Np * Mp),
        transcendentals=int(Np * Mp),
        bytes_accessed=int((Np * Dp + Mp * Dp) * itemsize
                           + Np * Mp * 4 + (Np + Mp) * 4),
    )

    out = pl.pallas_call(
        body,
        out_shape=jax.ShapeDtypeStruct((Np, Mp), jnp.float32),
        grid_spec=pltpu.PrefetchScalarGridSpec(
            num_scalar_prefetch=0,
            grid=grid,
            in_specs=in_specs,
            out_specs=out_specs,
            scratch_shapes=scratch,
        ),
        compiler_params=pltpu.CompilerParams(
            dimension_semantics=("parallel", "parallel", "arbitrary"),
            vmem_limit_bytes=48 * 1024 * 1024,
        ),
        cost_estimate=cost,
    )(gamma_arr, x_sq, l_sq, X, L)

    return out[:N, :M]


def identity_metric(X, landmark=None):
    """Default metric: plain passthrough (no Pallas copy — it's free this way)."""
    del landmark
    return X


# ---------------------------------------------------------------------------
# JAX port of the torchsl Kernel module
# ---------------------------------------------------------------------------

class Kernel:
    """forward(X) = metric(X, landmark, **params_dict), matching the nn.Module."""

    def __init__(self, metric=None, params_dict=None, landmark=None):
        self.metric = metric if metric is not None else identity_metric
        self.params_dict = dict() if params_dict is None else params_dict
        self.landmark = landmark
        assert callable(self.metric), "Metric is not callable."
        assert isinstance(self.params_dict, dict), (
            "Metric parameters must be of type dictionary.")

    def __call__(self, X):
        return self.metric(X, self.landmark, **self.params_dict)


# ---------------------------------------------------------------------------
# Reference (pure JAX) for correctness checking
# ---------------------------------------------------------------------------

def rbf_reference(X, L, gamma):
    X = X.astype(jnp.float32)
    L = L.astype(jnp.float32)
    d2 = (jnp.sum(X * X, -1)[:, None] + jnp.sum(L * L, -1)[None, :]
          - 2.0 * X @ L.T)
    d2 = jnp.maximum(d2, 0.0)
    return jnp.exp(-gamma * d2)


if __name__ == "__main__":
    key = jax.random.PRNGKey(0)
    k1, k2, k3, k4, k5, k6 = jax.random.split(key, 6)

    # Case 1: aligned shapes, f32, single-K path.
    N, M, D = 128, 128, 32
    gamma = 0.5
    X = jax.random.normal(k1, (N, D), dtype=jnp.float32)
    Lm = jax.random.normal(k2, (M, D), dtype=jnp.float32)
    rbf_module = Kernel(metric=rbf_metric, params_dict={"gamma": gamma},
                        landmark=Lm)
    K1 = jax.block_until_ready(rbf_module(X))
    assert K1.shape == (N, M)
    assert jnp.allclose(K1, rbf_reference(X, Lm, gamma),
                        atol=1e-3, rtol=1e-3), "RBF f32 mismatch"

    # Case 2: unaligned shapes (exercises zero-padding + output slicing).
    N2, M2, D2 = 100, 72, 40
    gamma2 = 1.3
    X2 = jax.random.normal(k3, (N2, D2), dtype=jnp.float32)
    L2 = jax.random.normal(k4, (M2, D2), dtype=jnp.float32)
    K2 = jax.block_until_ready(
        Kernel(metric=rbf_metric, params_dict={"gamma": gamma2},
               landmark=L2)(X2))
    assert K2.shape == (N2, M2)
    assert jnp.allclose(K2, rbf_reference(X2, L2, gamma2),
                        atol=1e-3, rtol=1e-3), "RBF padded mismatch"

    # Case 3: native bf16 operands to the MXU (f32 accumulation / f32 output).
    Xb = X.astype(jnp.bfloat16)
    Lb = Lm.astype(jnp.bfloat16)
    K3 = jax.block_until_ready(
        Kernel(metric=rbf_metric, params_dict={"gamma": gamma},
               landmark=Lb)(Xb))
    assert jnp.allclose(
        K3, rbf_reference(Xb.astype(jnp.float32), Lb.astype(jnp.float32), gamma),
        atol=5e-2, rtol=5e-2), "RBF bf16 mismatch"

    # Case 4: force the K-tiled (contraction-axis) accumulator path.
    N4, M4, D4 = 64, 128, 256
    gamma4 = 0.2
    X4 = jax.random.normal(k5, (N4, D4), dtype=jnp.float32)
    L4 = jax.random.normal(k6, (M4, D4), dtype=jnp.float32)
    K4 = jax.block_until_ready(
        Kernel(metric=rbf_metric,
               params_dict={"gamma": gamma4, "tk": 128},
               landmark=L4)(X4))
    assert jnp.allclose(K4, rbf_reference(X4, L4, gamma4),
                        atol=1e-3, rtol=1e-3), "RBF K-tiled mismatch"

    # Default identity metric (landmark unused) — returns X unchanged.
    Y = jax.block_until_ready(Kernel(metric=None)(X))
    assert jnp.array_equal(Y, X), "identity metric mismatch"

    print("KERNEL_OK")
</pallas_src>

<mosaic_0001>
module attributes {stable_mosaic.version = 11 : i64} {
  func.func @_rbf_kernel_single(%arg0: i32, %arg1: i32, %arg2: i32, %arg3: memref<1x1xf32, #tpu.memory_space<smem>>, %arg4: memref<128x1xf32, #tpu.memory_space<vmem>>, %arg5: memref<1x128xf32, #tpu.memory_space<vmem>>, %arg6: memref<128x32xf32, #tpu.memory_space<vmem>>, %arg7: memref<128x32xf32, #tpu.memory_space<vmem>>, %arg8: memref<128x128xf32, #tpu.memory_space<vmem>>) attributes {dimension_semantics = [#tpu.dimension_semantics<parallel>, #tpu.dimension_semantics<parallel>, #tpu.dimension_semantics<arbitrary>], iteration_bounds = array<i64: 1, 1, 1>, scalar_prefetch = 0 : i64, scratch_operands = 0 : i64, tpu.core_type = #tpu.core_type<tc>, window_params = [{transform_indices = @transform_0, window_bounds = array<i64: 1, 1>}, {transform_indices = @transform_1, window_bounds = array<i64: 128, 1>}, {transform_indices = @transform_2, window_bounds = array<i64: 1, 128>}, {transform_indices = @transform_3, window_bounds = array<i64: 128, 32>}, {transform_indices = @transform_4, window_bounds = array<i64: 128, 32>}, {transform_indices = @transform_5, window_bounds = array<i64: 128, 128>}]} {
    %c0 = arith.constant 0 : index
    %c0_0 = arith.constant 0 : index
    %0 = vector.load %arg6[%c0, %c0_0] : memref<128x32xf32, #tpu.memory_space<vmem>>, vector<128x32xf32>
    %c0_1 = arith.constant 0 : index
    %c0_2 = arith.constant 0 : index
    %1 = vector.load %arg7[%c0_1, %c0_2] : memref<128x32xf32, #tpu.memory_space<vmem>>, vector<128x32xf32>
    %cst = arith.constant dense<0.000000e+00> : vector<128x128xf32>
    %2 = tpu.matmul %0, %1, %cst {dimension_numbers = #tpu.dot_dimension_numbers<[1], [1], [0], [0], [0, 0, 1, 0], [], []>} : vector<128x32xf32>, vector<128x32xf32>, vector<128x128xf32> -> vector<128x128xf32>
    %c0_3 = arith.constant 0 : index
    %c0_4 = arith.constant 0 : index
    %3 = vector.load %arg4[%c0_3, %c0_4] : memref<128x1xf32, #tpu.memory_space<vmem>>, vector<128x1xf32>
    %c0_5 = arith.constant 0 : index
    %c0_6 = arith.constant 0 : index
    %4 = vector.load %arg5[%c0_5, %c0_6] : memref<1x128xf32, #tpu.memory_space<vmem>>, vector<1x128xf32>
    %5 = vector.broadcast %3 : vector<128x1xf32> to vector<128x128xf32>
    %6 = vector.broadcast %4 : vector<1x128xf32> to vector<128x128xf32>
    %7 = arith.addf %5, %6 : vector<128x128xf32>
    %cst_7 = arith.constant 2.000000e+00 : f32
    %8 = vector.broadcast %cst_7 : f32 to vector<128x128xf32>
    %9 = arith.mulf %8, %2 : vector<128x128xf32>
    %10 = arith.subf %7, %9 : vector<128x128xf32>
    %cst_8 = arith.constant 0.000000e+00 : f32
    %11 = vector.broadcast %cst_8 : f32 to vector<128x128xf32>
    %12 = arith.maximumf %10, %11 : vector<128x128xf32>
    %c0_9 = arith.constant 0 : index
    %c0_10 = arith.constant 0 : index
    %13 = memref.load %arg3[%c0_9, %c0_10] : memref<1x1xf32, #tpu.memory_space<smem>>
    %cst_11 = arith.constant 0.000000e+00 : f32
    %14 = arith.subf %cst_11, %13 : f32
    %15 = vector.broadcast %14 : f32 to vector<128x128xf32>
    %16 = arith.mulf %15, %12 : vector<128x128xf32>
    %17 = math.exp %16 : vector<128x128xf32>
    %c0_12 = arith.constant 0 : index
    %c0_13 = arith.constant 0 : index
    %18 = vector.load %arg8[%c0_12, %c0_13] : memref<128x128xf32, #tpu.memory_space<vmem>>, vector<128x128xf32>
    tpu.vector_store %arg8[%c0_12, %c0_13], %17 {strides = array<i32>} : memref<128x128xf32, #tpu.memory_space<vmem>>, vector<128x128xf32>,
    return
  }
  func.func @transform_0(%arg0: i32, %arg1: i32, %arg2: i32) -> (i32, i32) {
    %c0_i32 = arith.constant 0 : i32
    %c0_i32_0 = arith.constant 0 : i32
    %c0_i32_1 = arith.constant 0 : i32
    return %c0_i32, %c0_i32_0 : i32, i32
  }
  func.func @transform_1(%arg0: i32, %arg1: i32, %arg2: i32) -> (i32, i32) {
    %c0_i32 = arith.constant 0 : i32
    %c0_i32_0 = arith.constant 0 : i32
    return %arg0, %c0_i32 : i32, i32
  }
  func.func @transform_2(%arg0: i32, %arg1: i32, %arg2: i32) -> (i32, i32) {
    %c0_i32 = arith.constant 0 : i32
    %c0_i32_0 = arith.constant 0 : i32
    return %c0_i32, %arg1 : i32, i32
  }
  func.func @transform_3(%arg0: i32, %arg1: i32, %arg2: i32) -> (i32, i32) {
    %c0_i32 = arith.constant 0 : i32
    return %arg0, %arg2 : i32, i32
  }
  func.func @transform_4(%arg0: i32, %arg1: i32, %arg2: i32) -> (i32, i32) {
    %c0_i32 = arith.constant 0 : i32
    return %arg1, %arg2 : i32, i32
  }
  func.func @transform_5(%arg0: i32, %arg1: i32, %arg2: i32) -> (i32, i32) {
    %c0_i32 = arith.constant 0 : i32
    return %arg0, %arg1 : i32, i32
  }
}

</mosaic_0001>

<bundles_post_ra>
// kernel: tpu_custom_call.1
= control target key start
LH: loop header
LB: loop body
LE: loop exit
PB: predicated region body
PF: predicated region fallthrough
CT: control target
= control target key end

     0   :  { %vm54_vm0 = vcmask 261120   ;;  %v793_v6 = vmov 0   ;;  %s1117_s0 = inlined_call_operand.<no memory space> [shape: f32[1,1], index: 0, kind: input, shape index: {}]   ;;  %s1118_s1 = inlined_call_operand.vmem [shape: f32[128,1], index: 1, kind: input, shape index: {}]   ;;  %s1119_s2 = inlined_call_operand.vmem [shape: f32[1,128], index: 2, kind: input, shape index: {}]   ;;  %s1120_s3 = inlined_call_operand.vmem [shape: f32[128,32], index: 3, kind: input, shape index: {}]   ;;  %s1121_s4 = inlined_call_operand.vmem [shape: f32[128,32], index: 4, kind: input, shape index: {}]   ;;  %s1122_s5 = inlined_call_operand.hbm [shape: f32[128,128], index: 5, kind: output, shape index: {}]  }
   0x1   :  { %v38_v0 = vld [vmem:[%s1121_s4] sm:$0xff]  ;;  %v39_v1 = vld [vmem:[%s1121_s4 + $0x8] sm:$0xff]  ;;  %v40_v2 = vld [vmem:[%s1121_s4 + $0x10] sm:$0xff]  ;;  %736 = vset.pattern.permute.xlu1 %v793_v6  ;;  %735 = vset.pattern.permute.xlu0 %v793_v6 }
   0x2   :  { %v667_v3 = vpack.c.bf16 %v39_v1, %v38_v0  ;;  %vm838_vm1 = vmpackc.low %vm54_vm0, %vm54_vm0  ;;  %v41_v5 = vld [vmem:[%s1121_s4 + $0x18] sm:$0xff]  ;;  %v22_v8 = vld [vmem:[%s1120_s3] sm:$0xff] }
   0x3   :  { %v673_v7 = vpack.c.bf16 %v41_v5, %v40_v2  ;;  %v42_v9 = vld [vmem:[%s1121_s4 + $0x20] sm:$0xff]  ;;  %v43_v10 = vld [vmem:[%s1121_s4 + $0x28] sm:$0xff]  ;;  %643 = vmatprep.mubr.msk.f32.mxu0 %vm54_vm0, %v22_v8  ;;  %v298_v13 = vld [vmem:[%s1118_s1 + $0x10] sm:$0xff] }
   0x4   :  { %669 = vmatprep.subr.msk.bf16.mxu0 %vm838_vm1, %v667_v3  ;;  %715 = vmatprep.subr.msk.bf16.mxu1 %vm838_vm1, %v667_v3  ;;  %v30_v11 = vld [vmem:[%s1120_s3 + $0x40] sm:$0xff]  ;;  %v679_v12 = vpack.c.bf16 %v43_v10, %v42_v9  ;;  %v44_v15 = vld [vmem:[%s1121_s4 + $0x30] sm:$0xff]  ;;  %v45_v16 = vld [vmem:[%s1121_s4 + $0x38] sm:$0xff] }
   0x5   :  { %672 = vmatpush3.bf16.xpose.msk.msra.mxu0 %vm838_vm1, %v667_v3  ;;  %723 = vmatpush3.bf16.xpose.msk.msra.mxu1 %vm838_vm1, %v667_v3  ;;  %v296_v14 = vld [vmem:[%s1118_s1] sm:$0xff]  ;;  %v299_v17 = vld [vmem:[%s1118_s1 + $0x18] sm:$0xff]  ;;  %v297_v18 = vld [vmem:[%s1118_s1 + $0x8] sm:$0xff] }
   0x6   :  { %675 = vmatprep.subr.msk.bf16.mxu0 %vm838_vm1, %v673_v7  ;;  %716 = vmatprep.subr.msk.bf16.mxu1 %vm838_vm1, %v673_v7 }
   0x7   :  { %655 = vmatprep.mubr.msk.f32.mxu1 %vm54_vm0, %v30_v11  ;;  %325 = vperm.xlu1 %736, %v298_v13  }
   0x8   :  { %315 = vperm.xlu0 %735, %v296_v14  }
   0xd   :  { %678 = vmatpush3.bf16.xpose.msk.msra.mxu0 %vm838_vm1, %v673_v7  ;;  %724 = vmatpush3.bf16.xpose.msk.msra.mxu1 %vm838_vm1, %v673_v7 }
   0xe   :  { %681 = vmatprep.subr.msk.bf16.mxu0 %vm838_vm1, %v679_v12  ;;  %717 = vmatprep.subr.msk.bf16.mxu1 %vm838_vm1, %v679_v12 }
   0xf   :  { %11 = vsyncpa [#allocation4], 0  ;;  %v685_v19 = vpack.c.bf16 %v45_v16, %v44_v15  ;;  %330 = vperm.xlu1 %736, %v299_v17   ;;  %320 = vperm.xlu0 %735, %v297_v18   ;;  %v301_v20 = vld [vmem:[%s1118_s1 + $0x28] sm:$0xff]  ;;  %v300_v21 = vld [vmem:[%s1118_s1 + $0x20] sm:$0xff]  ;;  %s464_s13 = ssub.f32 0.0, %s1117_s0  ;;  %s794_s0 = smov [#allocation3]  }
  0x10   :  { %v46_v22 = vld [vmem:[%s1121_s4 + $0x40] sm:$0xff]  ;;  %v47_v23 = vld [vmem:[%s1121_s4 + $0x48] sm:$0xff]  ;;  %v303_v24 = vld [vmem:[%s1118_s1 + $0x38] sm:$0xff] }
  0x11   :  { %v302_v25 = vld [vmem:[%s1118_s1 + $0x30] sm:$0xff]  ;;  %v691_v26 = vpack.c.bf16 %v47_v23, %v46_v22  ;;  %v305_v27 = vld [vmem:[%s1118_s1 + $0x48] sm:$0xff]  ;;  %v304_v28 = vld [vmem:[%s1118_s1 + $0x40] sm:$0xff] }
  0x12   :  { %v48_v29 = vld [vmem:[%s1121_s4 + $0x50] sm:$0xff]  ;;  %v49_v30 = vld [vmem:[%s1121_s4 + $0x58] sm:$0xff]  ;;  %v309_v34 = vld [vmem:[%s1118_s1 + $0x68] sm:$0xff] }
  0x13   :  { %340 = vperm.xlu1 %736, %v301_v20   ;;  %335 = vperm.xlu0 %735, %v300_v21   ;;  %v307_v31 = vld [vmem:[%s1118_s1 + $0x58] sm:$0xff]  ;;  %v306_v32 = vld [vmem:[%s1118_s1 + $0x50] sm:$0xff]  ;;  %v697_v33 = vpack.c.bf16 %v49_v30, %v48_v29  ;;  %v308_v35 = vld [vmem:[%s1118_s1 + $0x60] sm:$0xff]  ;;  %v1071_v20 = vstv %s464_s13 }
  0x14   :  { %v50_v36 = vld [vmem:[%s1121_s4 + $0x60] sm:$0xff]  ;;  %v51_v37 = vld [vmem:[%s1121_s4 + $0x68] sm:$0xff]  ;;  %v311_v38 = vld [vmem:[%s1118_s1 + $0x78] sm:$0xff] }
  0x15   :  { %684 = vmatpush3.bf16.xpose.msk.msra.mxu0 %vm838_vm1, %v679_v12  ;;  %725 = vmatpush3.bf16.xpose.msk.msra.mxu1 %vm838_vm1, %v679_v12  ;;  %v310_v39 = vld [vmem:[%s1118_s1 + $0x70] sm:$0xff]  ;;  %v703_v40 = vpack.c.bf16 %v51_v37, %v50_v36  ;;  %v53_v42 = vld [vmem:[%s1121_s4 + $0x78] sm:$0xff]  ;;  %v23_v44 = vld [vmem:[%s1120_s3 + $0x8] sm:$0xff] }
  0x16   :  { %687 = vmatprep.subr.msk.bf16.mxu0 %vm838_vm1, %v685_v19  ;;  %718 = vmatprep.subr.msk.bf16.mxu1 %vm838_vm1, %v685_v19  ;;  %v52_v41 = vld [vmem:[%s1121_s4 + $0x70] sm:$0xff]  ;;  %v31_v45 = vld [vmem:[%s1120_s3 + $0x48] sm:$0xff]  ;;  %v25_v48 = vld [vmem:[%s1120_s3 + $0x18] sm:$0xff] }
  0x17   :  { %350 = vperm.xlu1 %736, %v303_v24   ;;  %345 = vperm.xlu0 %735, %v302_v25   ;;  %v709_v43 = vpack.c.bf16 %v53_v42, %v52_v41  ;;  %v24_v46 = vld [vmem:[%s1120_s3 + $0x10] sm:$0xff]  ;;  %v33_v49 = vld [vmem:[%s1120_s3 + $0x58] sm:$0xff]  ;;  %v26_v50 = vld [vmem:[%s1120_s3 + $0x20] sm:$0xff] }
  0x18   :  { %v32_v47 = vld [vmem:[%s1120_s3 + $0x50] sm:$0xff]  ;;  %v34_v51 = vld [vmem:[%s1120_s3 + $0x60] sm:$0xff]  ;;  %v27_v52 = vld [vmem:[%s1120_s3 + $0x28] sm:$0xff] }
  0x19   :  { %v35_v53 = vld [vmem:[%s1120_s3 + $0x68] sm:$0xff]  ;;  %v28_v54 = vld [vmem:[%s1120_s3 + $0x30] sm:$0xff]  ;;  %v29_v56 = vld [vmem:[%s1120_s3 + $0x38] sm:$0xff] }
  0x1a   :  { %v36_v55 = vld [vmem:[%s1120_s3 + $0x70] sm:$0xff]  ;;  %v37_v57 = vld [vmem:[%s1120_s3 + $0x78] sm:$0xff]  ;;  %v578_v8 = vld [vmem:[%s1119_s2] ss:$0 sm:$0xff]  ;;  %s535_s2 = sshll.u32 %s794_s0, 4  ;;  %s536_s2 = int_to_ptr.vmem [resolvable:$true] %s535_s2 }
  0x1b   :  { %360 = vperm.xlu1 %736, %v305_v27   ;;  %355 = vperm.xlu0 %735, %v304_v28   ;;  %s769_s14 = scalar_lea.vmem %s536_s2, 2048  ;;  %p774_p1 = scmp.lt.s32.totalorder %s536_s2, %s536_s2 }
  0x1c   :  { %p770_p0 = scmp.ne.s32.totalorder %s536_s2, %s769_s14  ;;  %p775_p2 = scmp.lt.s32.totalorder %s769_s14, %s769_s14 }
  0x1d   :  { %690 = vmatpush3.bf16.xpose.msk.msra.mxu0 %vm838_vm1, %v685_v19  ;;  %726 = vmatpush3.bf16.xpose.msk.msra.mxu1 %vm838_vm1, %v685_v19 }
  0x1e   :  { %693 = vmatprep.subr.msk.bf16.mxu0 %vm838_vm1, %v691_v26  ;;  %719 = vmatprep.subr.msk.bf16.mxu1 %vm838_vm1, %v691_v26  ;;  %p776_p3 = por %p775_p2, %p774_p1 }
  0x1f   :  { %370 = vperm.xlu1 %736, %v307_v31   ;;  %365 = vperm.xlu0 %735, %v306_v32  }
  0x20   :  { %p777_p4 = pnand %p776_p3, %p770_p0 }
  0x23   :  { %380 = vperm.xlu1 %736, %v309_v34   ;;  %375 = vperm.xlu0 %735, %v308_v35  }
  0x25   :  { %696 = vmatpush3.bf16.xpose.msk.msra.mxu0 %vm838_vm1, %v691_v26  ;;  %727 = vmatpush3.bf16.xpose.msk.msra.mxu1 %vm838_vm1, %v691_v26 }
  0x26   :  { %699 = vmatprep.subr.msk.bf16.mxu0 %vm838_vm1, %v697_v33  ;;  %720 = vmatprep.subr.msk.bf16.mxu1 %vm838_vm1, %v697_v33 }
  0x27   :  { %390 = vperm.xlu1 %736, %v311_v38   ;;  %385 = vperm.xlu0 %735, %v310_v39  }
  0x2d   :  { %702 = vmatpush3.bf16.xpose.msk.msra.mxu0 %vm838_vm1, %v697_v33  ;;  %728 = vmatpush3.bf16.xpose.msk.msra.mxu1 %vm838_vm1, %v697_v33 }
  0x2e   :  { %705 = vmatprep.subr.msk.bf16.mxu0 %vm838_vm1, %v703_v40  ;;  %721 = vmatprep.subr.msk.bf16.mxu1 %vm838_vm1, %v703_v40 }
  0x35   :  { %708 = vmatpush3.bf16.xpose.msk.msra.mxu0 %vm838_vm1, %v703_v40  ;;  %729 = vmatpush3.bf16.xpose.msk.msra.mxu1 %vm838_vm1, %v703_v40 }
  0x36   :  { %711 = vmatprep.subr.msk.bf16.mxu0 %vm838_vm1, %v709_v43  ;;  %722 = vmatprep.subr.msk.bf16.mxu1 %vm838_vm1, %v709_v43 }
  0x3d   :  { %714 = vmatpush3.bf16.xpose.msk.msra.mxu0 %vm838_vm1, %v709_v43  ;;  %730 = vmatpush3.bf16.xpose.msk.msra.mxu1 %vm838_vm1, %v709_v43 }
  0x44   :  { %644 = vmatmul.mubr.msk.f32.vlgmr.msra.gmra.mrb[0].mxu0 %vm54_vm0, %v23_v44  ;;  %656 = vmatmul.mubr.msk.f32.vlgmr.msra.gmra.mrb[0].mxu1 %vm54_vm0, %v31_v45 }
  0x45   :  { %646 = vmatprep.mubr.msk.f32.mxu0 %vm54_vm0, %v24_v46  ;;  %658 = vmatprep.mubr.msk.f32.mxu1 %vm54_vm0, %v32_v47 }
  0x48   :  { %647 = vmatmul.mubr.msk.f32.gmra.mrb[2].mxu0 %vm54_vm0, %v25_v48  ;;  %659 = vmatmul.mubr.msk.f32.gmra.mrb[2].mxu1 %vm54_vm0, %v33_v49 }
  0x49   :  { %649 = vmatprep.mubr.msk.f32.mxu0 %vm54_vm0, %v26_v50  ;;  %661 = vmatprep.mubr.msk.f32.mxu1 %vm54_vm0, %v34_v51 }
  0x4c   :  { %650 = vmatmul.mubr.msk.f32.gmra.mrb[4].mxu0 %vm54_vm0, %v27_v52  ;;  %662 = vmatmul.mubr.msk.f32.gmra.mrb[4].mxu1 %vm54_vm0, %v35_v53 }
  0x4d   :  { %652 = vmatprep.mubr.msk.f32.mxu0 %vm54_vm0, %v28_v54  ;;  %664 = vmatprep.mubr.msk.f32.mxu1 %vm54_vm0, %v36_v55 }
  0x50   :  { %653 = vmatmul.mubr.msk.f32.gmra.mrb[6].mxu0 %vm54_vm0, %v29_v56  ;;  %665 = vmatmul.mubr.msk.f32.gmra.mrb[6].mxu1 %vm54_vm0, %v37_v57 }
  0x86   :  { %v326_v58 = vpop.permute.xlu1 %325 }
  0x87   :  { %v316_v59 = vpop.permute.xlu0 %315  ;;  %v401_v9 = vadd.f32 %v578_v8, %v326_v58 }
  0x88   :  { %v399_v10 = vadd.f32 %v578_v8, %v316_v59 }
  0x8e   :  { %v331_v60 = vpop.permute.xlu1 %330  ;;  %v321_v61 = vpop.permute.xlu0 %320 }
  0x8f   :  { %v402_v11 = vadd.f32 %v578_v8, %v331_v60  ;;  %v400_v12 = vadd.f32 %v578_v8, %v321_v61 }
  0x92   :  { %v341_v62 = vpop.permute.xlu1 %340  ;;  %v336_v63 = vpop.permute.xlu0 %335 }
  0x93   :  { %v1063_v13 = vadd.f32 %v578_v8, %v341_v62  ;;  %v1065_v16 = vadd.f32 %v578_v8, %v336_v63 }
  0x96   :  { %v351_v0 = vpop.permute.xlu1 %350  ;;  %v346_v1 = vpop.permute.xlu0 %345 }
  0x97   :  { %v1067_v17 = vadd.f32 %v578_v8, %v351_v0  ;;  %v1069_v18 = vadd.f32 %v578_v8, %v346_v1 }
  0x9a   :  { %v361_v2 = vpop.permute.xlu1 %360  ;;  %v356_v3 = vpop.permute.xlu0 %355 }
  0x9b   :  { %v408_v22 = vadd.f32 %v578_v8, %v361_v2  ;;  %v407_v23 = vadd.f32 %v578_v8, %v356_v3 }
  0x9e   :  { %v371_v4 = vpop.permute.xlu1 %370  ;;  %v366_v5 = vpop.permute.xlu0 %365 }
  0x9f   :  { %v410_v28 = vadd.f32 %v578_v8, %v371_v4  ;;  %v409_v29 = vadd.f32 %v578_v8, %v366_v5 }
  0xa2   :  { %v381_v6 = vpop.permute.xlu1 %380  ;;  %v376_v7 = vpop.permute.xlu0 %375 }
  0xa3   :  { %v1073_v32 = vadd.f32 %v578_v8, %v381_v6  ;;  %v1075_v33 = vadd.f32 %v578_v8, %v376_v7 }
  0xa6   :  { %v391_v14 = vpop.permute.xlu1 %390  ;;  %v386_v15 = vpop.permute.xlu0 %385 }
  0xa7   :  { %v1077_v36 = vadd.f32 %v578_v8, %v391_v14  ;;  %v1079_v37 = vadd.f32 %v578_v8, %v386_v15 }
 0x117   :  { %v645_v19 = vpop.f32.mrb[0].mxu0  ;;  %v657_v21 = vpop.f32.mrb[0].mxu1 }
 0x118   :  { %v416_v24 = vmul.f32 2.0, %v645_v19  ;;  %v424_v25 = vmul.f32 2.0, %v657_v21  ;;  %v217_v26 = vpop.f32.mrb[1].mxu0  ;;  %v257_v27 = vpop.f32.mrb[1].mxu1 }
 0x119   :  { %v415_v30 = vmul.f32 2.0, %v217_v26  ;;  %v423_v31 = vmul.f32 2.0, %v257_v27 }
 0x11a   :  { %v432_v34 = vsub.f32 %v400_v12, %v416_v24  ;;  %v440_v35 = vsub.f32 %v408_v22, %v424_v25 }
 0x11b   :  { %v431_v38 = vsub.f32 %v399_v10, %v415_v30  ;;  %v439_v39 = vsub.f32 %v407_v23, %v423_v31  ;;  %v648_v40 = vpop.f32.mrb[2].mxu0  ;;  %v660_v41 = vpop.f32.mrb[2].mxu1 }
 0x11c   :  { %v448_v42 = vmax.f32 %v432_v34, 0.0  ;;  %v456_v43 = vmax.f32 %v440_v35, 0.0  ;;  %v418_v44 = vmul.f32 2.0, %v648_v40  ;;  %v426_v45 = vmul.f32 2.0, %v660_v41  ;;  %v227_v46 = vpop.f32.mrb[3].mxu0  ;;  %v267_v47 = vpop.f32.mrb[3].mxu1 }
 0x11d   :  { %v447_v48 = vmax.f32 %v431_v38, 0.0  ;;  %v455_v49 = vmax.f32 %v439_v39, 0.0  ;;  %v417_v50 = vmul.f32 2.0, %v227_v46  ;;  %v425_v51 = vmul.f32 2.0, %v267_v47 }
 0x11e   :  { %v467_v52 = vmul.f32 %v1071_v20, %v448_v42  ;;  %v475_v53 = vmul.f32 %v1071_v20, %v456_v43  ;;  %v434_v54 = vsub.f32 %v402_v11, %v418_v44  ;;  %v442_v55 = vsub.f32 %v410_v28, %v426_v45 }
 0x11f   :  { %v466_v56 = vmul.f32 %v1071_v20, %v447_v48  ;;  %v474_v57 = vmul.f32 %v1071_v20, %v455_v49  ;;  %v433_v58 = vsub.f32 %v401_v9, %v417_v50  ;;  %v441_v59 = vsub.f32 %v409_v29, %v425_v51  ;;  %v651_v60 = vpop.f32.mrb[4].mxu0  ;;  %v663_v61 = vpop.f32.mrb[4].mxu1 }
 0x120   :  { %v484_v62 = vmul.f32 1.442695, %v467_v52  ;;  %v500_v63 = vmul.f32 1.442695, %v475_v53  ;;  %v450_v0 = vmax.f32 %v434_v54, 0.0  ;;  %v458_v1 = vmax.f32 %v442_v55, 0.0 }
 0x121   :  { %v482_v2 = vmul.f32 1.442695, %v466_v56  ;;  %v498_v3 = vmul.f32 1.442695, %v474_v57  ;;  %v449_v4 = vmax.f32 %v433_v58, 0.0  ;;  %v457_v5 = vmax.f32 %v441_v59, 0.0 }
 0x122   :  { %737 = vpow2.f32 %v484_v62  ;;  %v469_v6 = vmul.f32 %v1071_v20, %v450_v0  ;;  %v477_v7 = vmul.f32 %v1071_v20, %v458_v1  ;;  %v420_v8 = vmul.f32 2.0, %v651_v60  ;;  %v237_v10 = vpop.f32.mrb[5].mxu0  ;;  %v277_v11 = vpop.f32.mrb[5].mxu1 }
 0x123   :  { %739 = vpow2.f32 %v500_v63  ;;  %v468_v9 = vmul.f32 %v1071_v20, %v449_v4  ;;  %v476_v12 = vmul.f32 %v1071_v20, %v457_v5  ;;  %v428_v14 = vmul.f32 2.0, %v663_v61  ;;  %v654_v15 = vpop.f32.mrb[6].mxu0  ;;  %v666_v19 = vpop.f32.mrb[6].mxu1 }
 0x124   :  { %741 = vpow2.f32 %v482_v2  ;;  %v488_v21 = vmul.f32 1.442695, %v469_v6  ;;  %v504_v22 = vmul.f32 1.442695, %v477_v7  ;;  %v436_v23 = vsub.f32 %v1063_v13, %v420_v8  ;;  %v247_v24 = vpop.f32.mrb[7].mxu0  ;;  %v287_v25 = vpop.f32.mrb[7].mxu1 }
 0x125   :  { %743 = vpow2.f32 %v498_v3  ;;  %v486_v26 = vmul.f32 1.442695, %v468_v9  ;;  %v502_v27 = vmul.f32 1.442695, %v476_v12  ;;  %v444_v28 = vsub.f32 %v1073_v32, %v428_v14 }
 0x126   :  { %745 = vpow2.f32 %v488_v21  ;;  %v452_v29 = vmax.f32 %v436_v23, 0.0  ;;  %v419_v30 = vmul.f32 2.0, %v237_v10  ;;  %v427_v31 = vmul.f32 2.0, %v277_v11 }
 0x127   :  { %747 = vpow2.f32 %v504_v22  ;;  %v460_v34 = vmax.f32 %v444_v28, 0.0  ;;  %v422_v35 = vmul.f32 2.0, %v654_v15  ;;  %v430_v38 = vmul.f32 2.0, %v666_v19 }
 0x128   :  { %749 = vpow2.f32 %v486_v26  ;;  %v471_v39 = vmul.f32 %v1071_v20, %v452_v29  ;;  %v435_v13 = vsub.f32 %v1065_v16, %v419_v30  ;;  %v443_v40 = vsub.f32 %v1075_v33, %v427_v31 }
 0x129   :  { %751 = vpow2.f32 %v502_v27  ;;  %v479_v41 = vmul.f32 %v1071_v20, %v460_v34  ;;  %v438_v32 = vsub.f32 %v1067_v17, %v422_v35  ;;  %v446_v42 = vsub.f32 %v1077_v36, %v430_v38 }
 0x12a   :  { %v492_v43 = vmul.f32 1.442695, %v471_v39  ;;  %v451_v44 = vmax.f32 %v435_v13, 0.0  ;;  %v459_v45 = vmax.f32 %v443_v40, 0.0  ;;  %v421_v46 = vmul.f32 2.0, %v247_v24 }
 0x12b   :  { %v508_v47 = vmul.f32 1.442695, %v479_v41  ;;  %v454_v48 = vmax.f32 %v438_v32, 0.0  ;;  %v462_v49 = vmax.f32 %v446_v42, 0.0  ;;  %v429_v50 = vmul.f32 2.0, %v287_v25 }
 0x12c   :  { %v738_v51 = vpop.eup %737  ;;  %753 = vpow2.f32 %v492_v43  ;;  %v470_v16 = vmul.f32 %v1071_v20, %v451_v44  ;;  %v478_v33 = vmul.f32 %v1071_v20, %v459_v45  ;;  %v437_v52 = vsub.f32 %v1069_v18, %v421_v46 }
 0x12d   :  { %v740_v53 = vpop.eup %739  ;;  %515 = vst [vmem:[#allocation3 + $0x8] sm:$0xff] %v738_v51  ;;  %755 = vpow2.f32 %v508_v47  ;;  %v473_v17 = vmul.f32 %v1071_v20, %v454_v48  ;;  %v481_v36 = vmul.f32 %v1071_v20, %v462_v49  ;;  %v445_v54 = vsub.f32 %v1079_v37, %v429_v50 }
 0x12e   :  { %v742_v55 = vpop.eup %741  ;;  %523 = vst [vmem:[#allocation3 + $0x48] sm:$0xff] %v740_v53  ;;  %v490_v56 = vmul.f32 1.442695, %v470_v16  ;;  %v506_v57 = vmul.f32 1.442695, %v478_v33  ;;  %v453_v58 = vmax.f32 %v437_v52, 0.0 }
 0x12f   :  { %v744_v59 = vpop.eup %743  ;;  %514 = vst [vmem:[#allocation3] sm:$0xff] %v742_v55  ;;  %v496_v60 = vmul.f32 1.442695, %v473_v17  ;;  %v512_v61 = vmul.f32 1.442695, %v481_v36  ;;  %v461_v62 = vmax.f32 %v445_v54, 0.0 }
 0x130   :  { %v746_v18 = vpop.eup %745  ;;  %522 = vst [vmem:[#allocation3 + $0x40] sm:$0xff] %v744_v59  ;;  %757 = vpow2.f32 %v490_v56  ;;  %v472_v63 = vmul.f32 %v1071_v20, %v453_v58 }
 0x131   :  { %v748_v0 = vpop.eup %747  ;;  %517 = vst [vmem:[#allocation3 + $0x18] sm:$0xff] %v746_v18  ;;  %759 = vpow2.f32 %v506_v57  ;;  %v480_v37 = vmul.f32 %v1071_v20, %v461_v62 }
 0x132   :  { %v750_v1 = vpop.eup %749  ;;  %525 = vst [vmem:[#allocation3 + $0x58] sm:$0xff] %v748_v0  ;;  %761 = vpow2.f32 %v496_v60  ;;  %v494_v2 = vmul.f32 1.442695, %v472_v63 }
 0x133   :  { %v752_v3 = vpop.eup %751  ;;  %516 = vst [vmem:[#allocation3 + $0x10] sm:$0xff] %v750_v1  ;;  %763 = vpow2.f32 %v512_v61  ;;  %v510_v4 = vmul.f32 1.442695, %v480_v37 }
 0x134   :  { %524 = vst [vmem:[#allocation3 + $0x50] sm:$0xff] %v752_v3  ;;  %765 = vpow2.f32 %v494_v2 }
 0x135   :  { %767 = vpow2.f32 %v510_v4 }
 0x136   :  { %v754_v5 = vpop.eup %753 }
 0x137   :  { %v756_v6 = vpop.eup %755  ;;  %519 = vst [vmem:[#allocation3 + $0x28] sm:$0xff] %v754_v5 }
 0x138   :  { %527 = vst [vmem:[#allocation3 + $0x68] sm:$0xff] %v756_v6 }
 0x13a   :  { %v758_v7 = vpop.eup %757 }
 0x13b   :  { %v760_v8 = vpop.eup %759  ;;  %518 = vst [vmem:[#allocation3 + $0x20] sm:$0xff] %v758_v7 }
 0x13c   :  { %v762_v20 = vpop.eup %761  ;;  %526 = vst [vmem:[#allocation3 + $0x60] sm:$0xff] %v760_v8 }
 0x13d   :  { %v764_v10 = vpop.eup %763  ;;  %521 = vst [vmem:[#allocation3 + $0x38] sm:$0xff] %v762_v20 }
 0x13e   :  { %v766_v11 = vpop.eup %765  ;;  %529 = vst [vmem:[#allocation3 + $0x78] sm:$0xff] %v764_v10 }
 0x13f   :  { %v768_v9 = vpop.eup %767  ;;  %520 = vst [vmem:[#allocation3 + $0x30] sm:$0xff] %v766_v11 }
 0x140   :  { %528 = vst [vmem:[#allocation3 + $0x70] sm:$0xff] %v768_v9 }
 0x141   :  { %780 = shalt.err (!%p777_p4)
}
 0x142   :  { %s781_s17 = scalar_lea.hbm %s1122_s5, 2048 }
 0x143   :  { %p782_p5 = scmp.ne.s32.totalorder %s1122_s5, %s781_s17  ;;  %p785_p6 = scmp.lt.u32.totalorder %s781_s17, %s1122_s5 }
 0x145   :  { %p787_p7 = pnand %p785_p6, %p782_p5 }
 0x147   :  { %790 = shalt.err (!%p787_p7)
}
 0x148   :  { %s795_s22 = smov 128   ;;  %s796_s23 = smov 8  }
 0x149   :  { %541 = dma.vmem_to_hbm [thread:$0]  %s536_s2, 2048, %s1122_s5, [#allocation4], %s795_s22, %s795_s22, %s796_s23  }
 0x14a   :  { %791 = dma.done.wait [#allocation4], 2048  }
 0x14b   :  { %792 = vsyncadd [#allocation4], 4294965248 }
 0x14c   :  { %545 = vsyncpa [#allocation4], 1 }

</bundles_post_ra>
